<compile_context>
chip_gen: v7x
topology: tpu7x:2x2x1
jax: 0.10.0
libtpu: 0.0.40
codegen_flags: <defaults>
</compile_context>

<pallas_src>
import functools

import jax
import jax.numpy as jnp
from jax.experimental import pallas as pl
from jax.experimental.pallas import tpu as pltpu

VMEM_SPEC = pl.BlockSpec(memory_space=pltpu.MemorySpace.VMEM)
LEAKY_SLOPE = 0.01      # F.leaky_relu default
LN_EPS = 1e-5           # nn.LayerNorm default
LANE_PAD = 128          # lane-dense width of both slabs and the final store
_W_ROW_ALIGN = 16       # bf16 sublane tile height -> aligned row offsets
_NEG_BIG = -1e30        # softmax mask value (avoids -inf NaN corner cases)

# bias/LN slab row indices (each row is one 128-lane-padded vector)
_B_HID, _B_QKV, _B_O, _B_F1, _B_F2, _B_G1, _B_BE1, _B_G2, _B_BE2, _B_FN = range(10)
_B_ROWS = 16


def _round_up(v, m):
    return (v + m - 1) // m * m


def _weight_layout(x_rows, in_dim, out_dim, fout_dim):
    """Row offset of each weight block inside the packed bf16 slab."""
    blocks = [("hid", x_rows), ("qkv", in_dim), ("wo", out_dim),
              ("w1", out_dim), ("w2", 2 * fout_dim), ("fn", fout_dim)]
    offs, row = {}, 0
    for name, rows in blocks:
        offs[name] = row
        row += _round_up(rows, _W_ROW_ALIGN)
    return offs, row


def _leaky_relu(y):
    return jnp.where(y > 0, y, LEAKY_SLOPE * y)


def _layernorm(h, gamma, beta):
    mu = jnp.mean(h, axis=-1, keepdims=True)
    var = jnp.mean((h - mu) ** 2, axis=-1, keepdims=True)
    return (h - mu) * jax.lax.rsqrt(var + LN_EPS) * gamma + beta


# --------------------------------------------------------------------------- #
# Fused kernel: hidden FC+leaky -> GT layer (MHA + FFN + LN) -> FN+leaky
# --------------------------------------------------------------------------- #
def gtm_fused_kernel(x_ref, w_ref, b_ref, o_ref, *, n, x_rows, in_dim, out_dim,
                     fout_dim, head_num, offs, residual, layer_norm):
    f32 = jnp.float32
    bf16 = jnp.bfloat16
    dh = out_dim // head_num
    hn = head_num * n

    # ---- X = F.leaky_relu(self.hidden(self.X)) ------------------------------
    h0 = jnp.dot(x_ref[...], w_ref[offs["hid"]:offs["hid"] + x_rows, :in_dim],
                 preferred_element_type=f32) + b_ref[_B_HID:_B_HID + 1, :in_dim]
    x = _leaky_relu(h0)                                     # (N, in_dim) f32
    x16 = x.astype(bf16)

    # ---- fused Q|K|V projection: one lane-dense (N, 3*out_dim) matmul -------
    # 1/sqrt(dh) is already folded into the Q columns / Q bias host-side.
    qkv = (jnp.dot(x16, w_ref[offs["qkv"]:offs["qkv"] + in_dim, :3 * out_dim],
                   preferred_element_type=f32)
           + b_ref[_B_QKV:_B_QKV + 1, :3 * out_dim]).astype(bf16)   # (N, 96)
    q2d = qkv[:, :out_dim]
    k2d = qkv[:, out_dim:2 * out_dim]
    v2d = qkv[:, 2 * out_dim:3 * out_dim]

    # head-major stacking (H*N, dh): static lane slices + sublane concat only
    def stack_heads(t):
        return jnp.concatenate(
            [t[:, h * dh:(h + 1) * dh] for h in range(head_num)], axis=0)

    qh = stack_heads(q2d)                                   # (HN, dh) bf16
    kh = stack_heads(k2d)
    vh = stack_heads(v2d)

    # ---- attention scores: ONE 2-D matmul + block-diagonal head mask --------
    s = jax.lax.dot_general(qh, kh, (((1,), (1,)), ((), ())),
                            preferred_element_type=f32)     # (HN, HN) = Q K^T
    head_of_row = jnp.concatenate(
        [jnp.full((n, 1), float(h), f32) for h in range(head_num)], axis=0)
    head_of_col = jnp.concatenate(
        [jnp.full((1, n), float(h), f32) for h in range(head_num)], axis=1)
    s = jnp.where(head_of_row == head_of_col, s, _NEG_BIG)

    s = s - jnp.max(s, axis=-1, keepdims=True)
    e = jnp.exp(s)
    p = e * pl.reciprocal(jnp.sum(e, axis=-1, keepdims=True), approx=True)

    ah = jnp.dot(p.astype(bf16), vh, preferred_element_type=f32)     # (HN, dh)
    # head-concat back to (N, H*dh) == (N, out_dim)
    ah2d = jnp.concatenate(
        [ah[h * n:(h + 1) * n, :] for h in range(head_num)], axis=1)

    # ---- O projection (single 2-D matmul == concat-then-project) ------------
    h1 = jnp.dot(ah2d.astype(bf16), w_ref[offs["wo"]:offs["wo"] + out_dim, :out_dim],
                 preferred_element_type=f32) + b_ref[_B_O:_B_O + 1, :out_dim]
    if residual:
        h1 = x + h1                       # requires in_dim == out_dim
    if layer_norm:
        h1 = _layernorm(h1, b_ref[_B_G1:_B_G1 + 1, :out_dim],
                        b_ref[_B_BE1:_B_BE1 + 1, :out_dim])

    # ---- FFN -----------------------------------------------------------------
    f = jnp.dot(h1.astype(bf16), w_ref[offs["w1"]:offs["w1"] + out_dim, :2 * fout_dim],
                preferred_element_type=f32) + b_ref[_B_F1:_B_F1 + 1, :2 * fout_dim]
    f = jnp.maximum(f, 0.0)
    f = jnp.dot(f.astype(bf16), w_ref[offs["w2"]:offs["w2"] + 2 * fout_dim, :fout_dim],
                preferred_element_type=f32) + b_ref[_B_F2:_B_F2 + 1, :fout_dim]
    if residual:
        f = h1 + f                        # requires fout_dim == out_dim
    if layer_norm:
        f = _layernorm(f, b_ref[_B_G2:_B_G2 + 1, :fout_dim],
                       b_ref[_B_BE2:_B_BE2 + 1, :fout_dim])

    # ---- h = F.leaky_relu(self.FN(h)); lane-dense (N, 128) padded store -----
    y = jnp.dot(f.astype(bf16), w_ref[offs["fn"]:offs["fn"] + fout_dim, :],
                preferred_element_type=f32) + b_ref[_B_FN:_B_FN + 1, :]
    o_ref[...] = _leaky_relu(y)


def gtm_net_forward(x_pad, w_slab, b_slab, *, n, x_rows, in_dim, out_dim,
                    fout_dim, head_num, residual, layer_norm, output_t, offs):
    kernel = functools.partial(
        gtm_fused_kernel, n=n, x_rows=x_rows, in_dim=in_dim, out_dim=out_dim,
        fout_dim=fout_dim, head_num=head_num, offs=offs,
        residual=residual, layer_norm=layer_norm)

    hn = head_num * n
    dh = out_dim // head_num
    flops = (2 * n * (x_rows * in_dim + in_dim * 3 * out_dim + out_dim * out_dim
                      + out_dim * 2 * fout_dim + 2 * fout_dim * fout_dim
                      + fout_dim * LANE_PAD)
             + 4 * hn * hn * dh)
    transcendentals = hn * hn + 4 * n
    bytes_accessed = (x_pad.size * 2 + w_slab.size * 2 + b_slab.size * 4
                      + n * LANE_PAD * 4)

    out_pad = pl.pallas_call(
        kernel,
        out_shape=jax.ShapeDtypeStruct((n, LANE_PAD), jnp.float32),
        in_specs=[VMEM_SPEC, VMEM_SPEC, VMEM_SPEC],
        out_specs=VMEM_SPEC,
        cost_estimate=pl.CostEstimate(flops=flops,
                                      transcendentals=transcendentals,
                                      bytes_accessed=bytes_accessed),
    )(x_pad, w_slab, b_slab)
    return out_pad[:, :output_t]


# --------------------------------------------------------------------------- #
# Parameter construction (deterministic, synthetic) + slab packing
# --------------------------------------------------------------------------- #
def _linear_params(key, din, dout):
    kw, kb = jax.random.split(key)
    scale = 1.0 / float(din) ** 0.5
    w = jax.random.uniform(kw, (din, dout), jnp.float32, -scale, scale)
    b = jax.random.uniform(kb, (dout,), jnp.float32, -scale, scale)
    return w, b


def make_packed_params(key, x_dim, in_dim, out_dim, fout_dim, head_num,
                       output_t, num_layers):
    dh = out_dim // head_num
    attn_scale = 1.0 / float(dh) ** 0.5
    x_rows = _round_up(x_dim, _W_ROW_ALIGN)
    offs, total_rows = _weight_layout(x_rows, in_dim, out_dim, fout_dim)

    keys = jax.random.split(key, 2 + num_layers)
    hw, hb = _linear_params(keys[0], x_dim, in_dim)
    fnw, fnb = _linear_params(keys[1], fout_dim, output_t)

    # Generate all L GraphTransformer layers (mirrors the module), but only the
    # last one feeds FN in the reference forward (`h = conv(X)` overwrites h).
    layers = []
    for li in range(num_layers):
        lk = jax.random.split(keys[2 + li], 6)
        wq, bq = _linear_params(lk[0], in_dim, out_dim)
        wk, bk = _linear_params(lk[1], in_dim, out_dim)
        wv, bv = _linear_params(lk[2], in_dim, out_dim)
        wo, bo = _linear_params(lk[3], out_dim, out_dim)
        w1, b1 = _linear_params(lk[4], out_dim, 2 * fout_dim)
        w2, b2 = _linear_params(lk[5], 2 * fout_dim, fout_dim)
        layers.append(dict(wq=wq, bq=bq, wk=wk, bk=bk, wv=wv, bv=bv,
                           wo=wo, bo=bo, w1=w1, b1=b1, w2=w2, b2=b2))
    last = layers[-1]

    # ---- bf16 weight slab (row-blocked, 128-lane padded) --------------------
    w_slab = jnp.zeros((total_rows, LANE_PAD), jnp.float32)
    w_slab = w_slab.at[offs["hid"]:offs["hid"] + x_dim, :in_dim].set(hw)
    wqkv = jnp.concatenate([last["wq"] * attn_scale, last["wk"], last["wv"]], axis=1)
    w_slab = w_slab.at[offs["qkv"]:offs["qkv"] + in_dim, :3 * out_dim].set(wqkv)
    w_slab = w_slab.at[offs["wo"]:offs["wo"] + out_dim, :out_dim].set(last["wo"])
    w_slab = w_slab.at[offs["w1"]:offs["w1"] + out_dim, :2 * fout_dim].set(last["w1"])
    w_slab = w_slab.at[offs["w2"]:offs["w2"] + 2 * fout_dim, :fout_dim].set(last["w2"])
    w_slab = w_slab.at[offs["fn"]:offs["fn"] + fout_dim, :output_t].set(fnw)
    w_slab = w_slab.astype(jnp.bfloat16)

    # ---- f32 bias / LayerNorm slab (one 128-lane row per vector) ------------
    b_slab = jnp.zeros((_B_ROWS, LANE_PAD), jnp.float32)
    b_slab = b_slab.at[_B_HID, :in_dim].set(hb)
    bqkv = jnp.concatenate([last["bq"] * attn_scale, last["bk"], last["bv"]])
    b_slab = b_slab.at[_B_QKV, :3 * out_dim].set(bqkv)
    b_slab = b_slab.at[_B_O, :out_dim].set(last["bo"])
    b_slab = b_slab.at[_B_F1, :2 * fout_dim].set(last["b1"])
    b_slab = b_slab.at[_B_F2, :fout_dim].set(last["b2"])
    b_slab = b_slab.at[_B_G1, :out_dim].set(1.0)    # LN1 gamma (beta row stays 0)
    b_slab = b_slab.at[_B_G2, :fout_dim].set(1.0)   # LN2 gamma (beta row stays 0)
    b_slab = b_slab.at[_B_FN, :output_t].set(fnb)

    return dict(w_slab=w_slab, b_slab=b_slab, offs=offs, x_rows=x_rows)


if __name__ == "__main__":
    # small shapes consistent with the module's forward
    N = 16          # number of nodes (rows of self.X)
    x_dim = 12      # self.X.size(1)
    in_dim = 32
    out_dim = 32
    fout_dim = 32
    head_num = 4
    output_t = 8
    L = 2
    residual = True
    layer_norm = True

    assert out_dim % head_num == 0
    if residual:
        assert in_dim == out_dim == fout_dim, "residual adds require matching dims"

    key = jax.random.PRNGKey(0)
    kx, kp = jax.random.split(key)
    X = jax.random.normal(kx, (N, x_dim), jnp.float32)
    params = make_packed_params(kp, x_dim, in_dim, out_dim, fout_dim, head_num,
                                output_t, L)

    # pad X columns to the slab row-block height and cast to bf16 host-side
    # (zero padding is exact: matching weight rows are zero)
    x_pad = jnp.zeros((N, params["x_rows"]), jnp.float32).at[:, :x_dim].set(X)
    x_pad = x_pad.astype(jnp.bfloat16)

    out = gtm_net_forward(
        x_pad, params["w_slab"], params["b_slab"],
        n=N, x_rows=params["x_rows"], in_dim=in_dim, out_dim=out_dim,
        fout_dim=fout_dim, head_num=head_num, residual=residual,
        layer_norm=layer_norm, output_t=output_t, offs=params["offs"])
    out = jax.block_until_ready(out)
    assert out.shape == (N, output_t)
    assert bool(jnp.all(jnp.isfinite(out)))
    print("KERNEL_OK")
</pallas_src>

<mosaic_0001>
module attributes {stable_mosaic.version = 11 : i64} {
  func.func @gtm_fused_kernel(%arg0: memref<16x16xbf16, #tpu.memory_space<vmem>>, %arg1: memref<208x128xbf16, #tpu.memory_space<vmem>>, %arg2: memref<16x128xf32, #tpu.memory_space<vmem>>, %arg3: memref<16x128xf32, #tpu.memory_space<vmem>>) attributes {dimension_semantics = [], scalar_prefetch = 0 : i64, scratch_operands = 0 : i64, tpu.core_type = #tpu.core_type<tc>} {
    %c0 = arith.constant 0 : index
    %c0_0 = arith.constant 0 : index
    %0 = vector.load %arg0[%c0, %c0_0] : memref<16x16xbf16, #tpu.memory_space<vmem>>, vector<16x16xbf16>
    %c0_1 = arith.constant 0 : index
    %c0_2 = arith.constant 0 : index
    %1 = vector.load %arg1[%c0_1, %c0_2] : memref<208x128xbf16, #tpu.memory_space<vmem>>, vector<16x32xbf16>
    %cst = arith.constant dense<0.000000e+00> : vector<16x32xf32>
    %2 = tpu.matmul %0, %1, %cst {dimension_numbers = #tpu.dot_dimension_numbers<[1], [0], [0], [1], [0, 0, 1, 1], [], []>} : vector<16x16xbf16>, vector<16x32xbf16>, vector<16x32xf32> -> vector<16x32xf32>
    %c0_3 = arith.constant 0 : index
    %c0_4 = arith.constant 0 : index
    %3 = vector.load %arg2[%c0_3, %c0_4] : memref<16x128xf32, #tpu.memory_space<vmem>>, vector<1x32xf32>
    %4 = vector.broadcast %3 : vector<1x32xf32> to vector<16x32xf32>
    %5 = arith.addf %2, %4 : vector<16x32xf32>
    %cst_5 = arith.constant 0.000000e+00 : f32
    %6 = vector.broadcast %cst_5 : f32 to vector<16x32xf32>
    %7 = arith.cmpf ogt, %5, %6 : vector<16x32xf32>
    %cst_6 = arith.constant 0.00999999977 : f32
    %8 = vector.broadcast %cst_6 : f32 to vector<16x32xf32>
    %9 = arith.mulf %8, %5 : vector<16x32xf32>
    %10 = arith.select %7, %5, %9 : vector<16x32xi1>, vector<16x32xf32>
    %11 = arith.truncf %10 : vector<16x32xf32> to vector<16x32xbf16>
    %c16 = arith.constant 16 : index
    %c0_7 = arith.constant 0 : index
    %12 = vector.load %arg1[%c16, %c0_7] : memref<208x128xbf16, #tpu.memory_space<vmem>>, vector<32x96xbf16>
    %cst_8 = arith.constant dense<0.000000e+00> : vector<16x96xf32>
    %13 = tpu.matmul %11, %12, %cst_8 {dimension_numbers = #tpu.dot_dimension_numbers<[1], [0], [0], [1], [0, 0, 1, 1], [], []>} : vector<16x32xbf16>, vector<32x96xbf16>, vector<16x96xf32> -> vector<16x96xf32>
    %c1 = arith.constant 1 : index
    %c0_9 = arith.constant 0 : index
    %14 = vector.load %arg2[%c1, %c0_9] : memref<16x128xf32, #tpu.memory_space<vmem>>, vector<1x96xf32>
    %15 = vector.broadcast %14 : vector<1x96xf32> to vector<16x96xf32>
    %16 = arith.addf %13, %15 : vector<16x96xf32>
    %17 = arith.truncf %16 : vector<16x96xf32> to vector<16x96xbf16>
    %18 = vector.extract_strided_slice %17 {offsets = [0, 0], sizes = [16, 32], strides = [1, 1]} : vector<16x96xbf16> to vector<16x32xbf16>
    %19 = vector.extract_strided_slice %17 {offsets = [0, 32], sizes = [16, 32], strides = [1, 1]} : vector<16x96xbf16> to vector<16x32xbf16>
    %20 = vector.extract_strided_slice %17 {offsets = [0, 64], sizes = [16, 32], strides = [1, 1]} : vector<16x96xbf16> to vector<16x32xbf16>
    %21 = vector.extract_strided_slice %18 {offsets = [0, 0], sizes = [16, 8], strides = [1, 1]} : vector<16x32xbf16> to vector<16x8xbf16>
    %22 = vector.extract_strided_slice %18 {offsets = [0, 8], sizes = [16, 8], strides = [1, 1]} : vector<16x32xbf16> to vector<16x8xbf16>
    %23 = vector.extract_strided_slice %18 {offsets = [0, 16], sizes = [16, 8], strides = [1, 1]} : vector<16x32xbf16> to vector<16x8xbf16>
    %24 = vector.extract_strided_slice %18 {offsets = [0, 24], sizes = [16, 8], strides = [1, 1]} : vector<16x32xbf16> to vector<16x8xbf16>
    %25 = tpu.concatenate %21, %22, %23, %24 in 0 : vector<16x8xbf16>, vector<16x8xbf16>, vector<16x8xbf16>, vector<16x8xbf16> -> vector<64x8xbf16>
    %26 = vector.extract_strided_slice %19 {offsets = [0, 0], sizes = [16, 8], strides = [1, 1]} : vector<16x32xbf16> to vector<16x8xbf16>
    %27 = vector.extract_strided_slice %19 {offsets = [0, 8], sizes = [16, 8], strides = [1, 1]} : vector<16x32xbf16> to vector<16x8xbf16>
    %28 = vector.extract_strided_slice %19 {offsets = [0, 16], sizes = [16, 8], strides = [1, 1]} : vector<16x32xbf16> to vector<16x8xbf16>
    %29 = vector.extract_strided_slice %19 {offsets = [0, 24], sizes = [16, 8], strides = [1, 1]} : vector<16x32xbf16> to vector<16x8xbf16>
    %30 = tpu.concatenate %26, %27, %28, %29 in 0 : vector<16x8xbf16>, vector<16x8xbf16>, vector<16x8xbf16>, vector<16x8xbf16> -> vector<64x8xbf16>
    %31 = vector.extract_strided_slice %20 {offsets = [0, 0], sizes = [16, 8], strides = [1, 1]} : vector<16x32xbf16> to vector<16x8xbf16>
    %32 = vector.extract_strided_slice %20 {offsets = [0, 8], sizes = [16, 8], strides = [1, 1]} : vector<16x32xbf16> to vector<16x8xbf16>
    %33 = vector.extract_strided_slice %20 {offsets = [0, 16], sizes = [16, 8], strides = [1, 1]} : vector<16x32xbf16> to vector<16x8xbf16>
    %34 = vector.extract_strided_slice %20 {offsets = [0, 24], sizes = [16, 8], strides = [1, 1]} : vector<16x32xbf16> to vector<16x8xbf16>
    %35 = tpu.concatenate %31, %32, %33, %34 in 0 : vector<16x8xbf16>, vector<16x8xbf16>, vector<16x8xbf16>, vector<16x8xbf16> -> vector<64x8xbf16>
    %cst_10 = arith.constant dense<0.000000e+00> : vector<64x64xf32>
    %36 = tpu.matmul %25, %30, %cst_10 {dimension_numbers = #tpu.dot_dimension_numbers<[1], [1], [0], [0], [0, 0, 1, 0], [], []>} : vector<64x8xbf16>, vector<64x8xbf16>, vector<64x64xf32> -> vector<64x64xf32>
    %cst_11 = arith.constant 0.000000e+00 : f32
    %37 = vector.broadcast %cst_11 : f32 to vector<16x1xf32>
    %cst_12 = arith.constant 1.000000e+00 : f32
    %38 = vector.broadcast %cst_12 : f32 to vector<16x1xf32>
    %cst_13 = arith.constant 2.000000e+00 : f32
    %39 = vector.broadcast %cst_13 : f32 to vector<16x1xf32>
    %cst_14 = arith.constant 3.000000e+00 : f32
    %40 = vector.broadcast %cst_14 : f32 to vector<16x1xf32>
    %41 = tpu.concatenate %37, %38, %39, %40 in 0 : vector<16x1xf32>, vector<16x1xf32>, vector<16x1xf32>, vector<16x1xf32> -> vector<64x1xf32>
    %cst_15 = arith.constant 0.000000e+00 : f32
    %42 = vector.broadcast %cst_15 : f32 to vector<1x16xf32>
    %cst_16 = arith.constant 1.000000e+00 : f32
    %43 = vector.broadcast %cst_16 : f32 to vector<1x16xf32>
    %cst_17 = arith.constant 2.000000e+00 : f32
    %44 = vector.broadcast %cst_17 : f32 to vector<1x16xf32>
    %cst_18 = arith.constant 3.000000e+00 : f32
    %45 = vector.broadcast %cst_18 : f32 to vector<1x16xf32>
    %46 = tpu.concatenate %42, %43, %44, %45 in 1 : vector<1x16xf32>, vector<1x16xf32>, vector<1x16xf32>, vector<1x16xf32> -> vector<1x64xf32>
    %47 = vector.broadcast %41 : vector<64x1xf32> to vector<64x64xf32>
    %48 = vector.broadcast %46 : vector<1x64xf32> to vector<64x64xf32>
    %49 = arith.cmpf oeq, %47, %48 : vector<64x64xf32>
    %cst_19 = arith.constant -1.000000e+30 : f32
    %50 = vector.broadcast %cst_19 : f32 to vector<64x64xf32>
    %51 = arith.select %49, %36, %50 : vector<64x64xi1>, vector<64x64xf32>
    %cst_20 = arith.constant dense<0xFF800000> : vector<64xf32>
    %52 = vector.multi_reduction <maximumf>, %51, %cst_20 [1] : vector<64x64xf32> to vector<64xf32>
    %53 = vector.shape_cast %52 : vector<64xf32> to vector<64x1xf32>
    %54 = vector.broadcast %53 : vector<64x1xf32> to vector<64x64xf32>
    %55 = arith.subf %51, %54 : vector<64x64xf32>
    %56 = math.exp %55 : vector<64x64xf32>
    %cst_21 = arith.constant dense<0.000000e+00> : vector<64xf32>
    %57 = vector.multi_reduction <add>, %56, %cst_21 [1] : vector<64x64xf32> to vector<64xf32>
    %58 = vector.shape_cast %57 : vector<64xf32> to vector<64x1xf32>
    %59 = tpu.reciprocal %58 {approx = true} : vector<64x1xf32> -> vector<64x1xf32>
    %60 = vector.broadcast %59 : vector<64x1xf32> to vector<64x64xf32>
    %61 = arith.mulf %56, %60 : vector<64x64xf32>
    %62 = arith.truncf %61 : vector<64x64xf32> to vector<64x64xbf16>
    %cst_22 = arith.constant dense<0.000000e+00> : vector<64x8xf32>
    %63 = tpu.matmul %62, %35, %cst_22 {dimension_numbers = #tpu.dot_dimension_numbers<[1], [0], [0], [1], [0, 0, 1, 1], [], []>} : vector<64x64xbf16>, vector<64x8xbf16>, vector<64x8xf32> -> vector<64x8xf32>
    %64 = vector.extract_strided_slice %63 {offsets = [0, 0], sizes = [16, 8], strides = [1, 1]} : vector<64x8xf32> to vector<16x8xf32>
    %65 = vector.extract_strided_slice %63 {offsets = [16, 0], sizes = [16, 8], strides = [1, 1]} : vector<64x8xf32> to vector<16x8xf32>
    %66 = vector.extract_strided_slice %63 {offsets = [32, 0], sizes = [16, 8], strides = [1, 1]} : vector<64x8xf32> to vector<16x8xf32>
    %67 = vector.extract_strided_slice %63 {offsets = [48, 0], sizes = [16, 8], strides = [1, 1]} : vector<64x8xf32> to vector<16x8xf32>
    %68 = tpu.concatenate %64, %65, %66, %67 in 1 : vector<16x8xf32>, vector<16x8xf32>, vector<16x8xf32>, vector<16x8xf32> -> vector<16x32xf32>
    %69 = arith.truncf %68 : vector<16x32xf32> to vector<16x32xbf16>
    %c48 = arith.constant 48 : index
    %c0_23 = arith.constant 0 : index
    %70 = vector.load %arg1[%c48, %c0_23] : memref<208x128xbf16, #tpu.memory_space<vmem>>, vector<32x32xbf16>
    %cst_24 = arith.constant dense<0.000000e+00> : vector<16x32xf32>
    %71 = tpu.matmul %69, %70, %cst_24 {dimension_numbers = #tpu.dot_dimension_numbers<[1], [0], [0], [1], [0, 0, 1, 1], [], []>} : vector<16x32xbf16>, vector<32x32xbf16>, vector<16x32xf32> -> vector<16x32xf32>
    %c2 = arith.constant 2 : index
    %c0_25 = arith.constant 0 : index
    %72 = vector.load %arg2[%c2, %c0_25] : memref<16x128xf32, #tpu.memory_space<vmem>>, vector<1x32xf32>
    %73 = vector.broadcast %72 : vector<1x32xf32> to vector<16x32xf32>
    %74 = arith.addf %71, %73 : vector<16x32xf32>
    %75 = arith.addf %10, %74 : vector<16x32xf32>
    %c5 = arith.constant 5 : index
    %c0_26 = arith.constant 0 : index
    %76 = vector.load %arg2[%c5, %c0_26] : memref<16x128xf32, #tpu.memory_space<vmem>>, vector<1x32xf32>
    %c6 = arith.constant 6 : index
    %c0_27 = arith.constant 0 : index
    %77 = vector.load %arg2[%c6, %c0_27] : memref<16x128xf32, #tpu.memory_space<vmem>>, vector<1x32xf32>
    %cst_28 = arith.constant dense<0.000000e+00> : vector<16xf32>
    %78 = vector.multi_reduction <add>, %75, %cst_28 [1] : vector<16x32xf32> to vector<16xf32>
    %79 = vector.shape_cast %78 : vector<16xf32> to vector<16x1xf32>
    %cst_29 = arith.constant 3.200000e+01 : f32
    %80 = vector.broadcast %cst_29 : f32 to vector<16x1xf32>
    %81 = arith.divf %79, %80 : vector<16x1xf32>
    %82 = vector.broadcast %81 : vector<16x1xf32> to vector<16x32xf32>
    %83 = arith.subf %75, %82 : vector<16x32xf32>
    %84 = arith.mulf %83, %83 : vector<16x32xf32>
    %cst_30 = arith.constant dense<0.000000e+00> : vector<16xf32>
    %85 = vector.multi_reduction <add>, %84, %cst_30 [1] : vector<16x32xf32> to vector<16xf32>
    %86 = vector.shape_cast %85 : vector<16xf32> to vector<16x1xf32>
    %cst_31 = arith.constant 3.200000e+01 : f32
    %87 = vector.broadcast %cst_31 : f32 to vector<16x1xf32>
    %88 = arith.divf %86, %87 : vector<16x1xf32>
    %89 = vector.broadcast %81 : vector<16x1xf32> to vector<16x32xf32>
    %90 = arith.subf %75, %89 : vector<16x32xf32>
    %cst_32 = arith.constant 9.99999974E-6 : f32
    %91 = vector.broadcast %cst_32 : f32 to vector<16x1xf32>
    %92 = arith.addf %88, %91 : vector<16x1xf32>
    %93 = math.rsqrt %92 : vector<16x1xf32>
    %94 = vector.broadcast %93 : vector<16x1xf32> to vector<16x32xf32>
    %95 = arith.mulf %90, %94 : vector<16x32xf32>
    %96 = vector.broadcast %76 : vector<1x32xf32> to vector<16x32xf32>
    %97 = arith.mulf %95, %96 : vector<16x32xf32>
    %98 = vector.broadcast %77 : vector<1x32xf32> to vector<16x32xf32>
    %99 = arith.addf %97, %98 : vector<16x32xf32>
    %100 = arith.truncf %99 : vector<16x32xf32> to vector<16x32xbf16>
    %c80 = arith.constant 80 : index
    %c0_33 = arith.constant 0 : index
    %101 = vector.load %arg1[%c80, %c0_33] : memref<208x128xbf16, #tpu.memory_space<vmem>>, vector<32x64xbf16>
    %cst_34 = arith.constant dense<0.000000e+00> : vector<16x64xf32>
    %102 = tpu.matmul %100, %101, %cst_34 {dimension_numbers = #tpu.dot_dimension_numbers<[1], [0], [0], [1], [0, 0, 1, 1], [], []>} : vector<16x32xbf16>, vector<32x64xbf16>, vector<16x64xf32> -> vector<16x64xf32>
    %c3 = arith.constant 3 : index
    %c0_35 = arith.constant 0 : index
    %103 = vector.load %arg2[%c3, %c0_35] : memref<16x128xf32, #tpu.memory_space<vmem>>, vector<1x64xf32>
    %104 = vector.broadcast %103 : vector<1x64xf32> to vector<16x64xf32>
    %105 = arith.addf %102, %104 : vector<16x64xf32>
    %cst_36 = arith.constant 0.000000e+00 : f32
    %106 = vector.broadcast %cst_36 : f32 to vector<16x64xf32>
    %107 = arith.maximumf %105, %106 : vector<16x64xf32>
    %108 = arith.truncf %107 : vector<16x64xf32> to vector<16x64xbf16>
    %c112 = arith.constant 112 : index
    %c0_37 = arith.constant 0 : index
    %109 = vector.load %arg1[%c112, %c0_37] : memref<208x128xbf16, #tpu.memory_space<vmem>>, vector<64x32xbf16>
    %cst_38 = arith.constant dense<0.000000e+00> : vector<16x32xf32>
    %110 = tpu.matmul %108, %109, %cst_38 {dimension_numbers = #tpu.dot_dimension_numbers<[1], [0], [0], [1], [0, 0, 1, 1], [], []>} : vector<16x64xbf16>, vector<64x32xbf16>, vector<16x32xf32> -> vector<16x32xf32>
    %c4 = arith.constant 4 : index
    %c0_39 = arith.constant 0 : index
    %111 = vector.load %arg2[%c4, %c0_39] : memref<16x128xf32, #tpu.memory_space<vmem>>, vector<1x32xf32>
    %112 = vector.broadcast %111 : vector<1x32xf32> to vector<16x32xf32>
    %113 = arith.addf %110, %112 : vector<16x32xf32>
    %114 = arith.addf %99, %113 : vector<16x32xf32>
    %c7 = arith.constant 7 : index
    %c0_40 = arith.constant 0 : index
    %115 = vector.load %arg2[%c7, %c0_40] : memref<16x128xf32, #tpu.memory_space<vmem>>, vector<1x32xf32>
    %c8 = arith.constant 8 : index
    %c0_41 = arith.constant 0 : index
    %116 = vector.load %arg2[%c8, %c0_41] : memref<16x128xf32, #tpu.memory_space<vmem>>, vector<1x32xf32>
    %cst_42 = arith.constant dense<0.000000e+00> : vector<16xf32>
    %117 = vector.multi_reduction <add>, %114, %cst_42 [1] : vector<16x32xf32> to vector<16xf32>
    %118 = vector.shape_cast %117 : vector<16xf32> to vector<16x1xf32>
    %cst_43 = arith.constant 3.200000e+01 : f32
    %119 = vector.broadcast %cst_43 : f32 to vector<16x1xf32>
    %120 = arith.divf %118, %119 : vector<16x1xf32>
    %121 = vector.broadcast %120 : vector<16x1xf32> to vector<16x32xf32>
    %122 = arith.subf %114, %121 : vector<16x32xf32>
    %123 = arith.mulf %122, %122 : vector<16x32xf32>
    %cst_44 = arith.constant dense<0.000000e+00> : vector<16xf32>
    %124 = vector.multi_reduction <add>, %123, %cst_44 [1] : vector<16x32xf32> to vector<16xf32>
    %125 = vector.shape_cast %124 : vector<16xf32> to vector<16x1xf32>
    %cst_45 = arith.constant 3.200000e+01 : f32
    %126 = vector.broadcast %cst_45 : f32 to vector<16x1xf32>
    %127 = arith.divf %125, %126 : vector<16x1xf32>
    %128 = vector.broadcast %120 : vector<16x1xf32> to vector<16x32xf32>
    %129 = arith.subf %114, %128 : vector<16x32xf32>
    %cst_46 = arith.constant 9.99999974E-6 : f32
    %130 = vector.broadcast %cst_46 : f32 to vector<16x1xf32>
    %131 = arith.addf %127, %130 : vector<16x1xf32>
    %132 = math.rsqrt %131 : vector<16x1xf32>
    %133 = vector.broadcast %132 : vector<16x1xf32> to vector<16x32xf32>
    %134 = arith.mulf %129, %133 : vector<16x32xf32>
    %135 = vector.broadcast %115 : vector<1x32xf32> to vector<16x32xf32>
    %136 = arith.mulf %134, %135 : vector<16x32xf32>
    %137 = vector.broadcast %116 : vector<1x32xf32> to vector<16x32xf32>
    %138 = arith.addf %136, %137 : vector<16x32xf32>
    %139 = arith.truncf %138 : vector<16x32xf32> to vector<16x32xbf16>
    %c176 = arith.constant 176 : index
    %c0_47 = arith.constant 0 : index
    %140 = vector.load %arg1[%c176, %c0_47] : memref<208x128xbf16, #tpu.memory_space<vmem>>, vector<32x128xbf16>
    %cst_48 = arith.constant dense<0.000000e+00> : vector<16x128xf32>
    %141 = tpu.matmul %139, %140, %cst_48 {dimension_numbers = #tpu.dot_dimension_numbers<[1], [0], [0], [1], [0, 0, 1, 1], [], []>} : vector<16x32xbf16>, vector<32x128xbf16>, vector<16x128xf32> -> vector<16x128xf32>
    %c9 = arith.constant 9 : index
    %c0_49 = arith.constant 0 : index
    %142 = vector.load %arg2[%c9, %c0_49] : memref<16x128xf32, #tpu.memory_space<vmem>>, vector<1x128xf32>
    %143 = vector.broadcast %142 : vector<1x128xf32> to vector<16x128xf32>
    %144 = arith.addf %141, %143 : vector<16x128xf32>
    %cst_50 = arith.constant 0.000000e+00 : f32
    %145 = vector.broadcast %cst_50 : f32 to vector<16x128xf32>
    %146 = arith.cmpf ogt, %144, %145 : vector<16x128xf32>
    %cst_51 = arith.constant 0.00999999977 : f32
    %147 = vector.broadcast %cst_51 : f32 to vector<16x128xf32>
    %148 = arith.mulf %147, %144 : vector<16x128xf32>
    %149 = arith.select %146, %144, %148 : vector<16x128xi1>, vector<16x128xf32>
    %c0_52 = arith.constant 0 : index
    %c0_53 = arith.constant 0 : index
    %150 = vector.load %arg3[%c0_52, %c0_53] : memref<16x128xf32, #tpu.memory_space<vmem>>, vector<16x128xf32>
    tpu.vector_store %arg3[%c0_52, %c0_53], %149 {strides = array<i32>} : memref<16x128xf32, #tpu.memory_space<vmem>>, vector<16x128xf32>,
    return
  }
}

</mosaic_0001>

<bundles_post_ra>
// kernel: tpu_custom_call.1
= control target key start
LH: loop header
LB: loop body
LE: loop exit
PB: predicated region body
PF: predicated region fallthrough
CT: control target
= control target key end

     0   :  { %8 = vsyncpa [#allocation3], 0  ;;  %s1512_s0 = inlined_call_operand.hbm [shape: bf16[16,16], index: 0, kind: input, shape index: {}]   ;;  %s1513_s1 = inlined_call_operand.hbm [shape: bf16[208,128], index: 1, kind: input, shape index: {}]   ;;  %s1514_s2 = inlined_call_operand.hbm [shape: f32[16,128], index: 2, kind: input, shape index: {}]   ;;  %s1515_s3 = inlined_call_operand.hbm [shape: f32[16,128], index: 3, kind: output, shape index: {}]  }
   0x1   :  { %9 = vsyncpa [#allocation6], 0 }
   0x2   :  { %10 = vsyncpa [#allocation4], 0  ;;  %s1292_s12 = smov [#allocation5]   ;;  %s1293_s14 = smov [#allocation2]  }
   0x3   :  { %s28_s13 = sshll.u32 %s1292_s12, 4  ;;  %s16_s15 = sshll.u32 %s1293_s14, 4  ;;  %s29_s13 = int_to_ptr.vmem [resolvable:$true] %s28_s13  ;;  %s1330_s15 = int_to_ptr.vmem [resolvable:$true] %s16_s15 }
   0x4   :  { %s1198_s18 = scalar_lea.hbm %s1513_s1, 1664 }
   0x5   :  { %p1199_p0 = scmp.ne.s32.totalorder %s1513_s1, %s1198_s18  ;;  %p1202_p1 = scmp.lt.u32.totalorder %s1198_s18, %s1513_s1 }
   0x7   :  { %p1204_p2 = pnand %p1202_p1, %p1199_p0 }
   0x9   :  { %1207 = shalt.err (!%p1204_p2)
}
   0xa   :  { %s1208_s23 = scalar_lea.vmem %s29_s13, 1664  ;;  %p1213_p4 = scmp.lt.s32.totalorder %s29_s13, %s29_s13 }
   0xb   :  { %p1209_p3 = scmp.ne.s32.totalorder %s29_s13, %s1208_s23  ;;  %p1214_p5 = scmp.lt.s32.totalorder %s1208_s23, %s1208_s23 }
   0xd   :  { %p1215_p6 = por %p1214_p5, %p1213_p4 }
   0xf   :  { %p1216_p7 = pnand %p1215_p6, %p1209_p3 }
  0x11   :  { %1219 = shalt.err (!%p1216_p7)
}
  0x12   :  { %s1294_s24 = smov 64   ;;  %s1295_s25 = smov 4  }
  0x13   :  { %34 = dma.hbm_to_vmem [thread:$0]  %s1513_s1, 1664, %s29_s13, [#allocation6], %s1294_s24, %s1294_s24, %s1295_s25  }
  0x14   :  { %s1220_s30 = scalar_lea.hbm %s1512_s0, 128 }
  0x15   :  { %p1221_p8 = scmp.ne.s32.totalorder %s1512_s0, %s1220_s30  ;;  %p1224_p9 = scmp.lt.u32.totalorder %s1220_s30, %s1512_s0 }
  0x17   :  { %p1226_p10 = pnand %p1224_p9, %p1221_p8 }
  0x19   :  { %1229 = shalt.err (!%p1226_p10)
}
  0x1a   :  { %s1230_s8 = scalar_lea.vmem %s1330_s15, 128  ;;  %p1235_p12 = scmp.lt.s32.totalorder %s1330_s15, %s1330_s15 }
  0x1b   :  { %p1231_p11 = scmp.ne.s32.totalorder %s1330_s15, %s1230_s8  ;;  %p1236_p13 = scmp.lt.s32.totalorder %s1230_s8, %s1230_s8 }
  0x1d   :  { %p1237_p0 = por %p1236_p13, %p1235_p12 }
  0x1f   :  { %p1238_p1 = pnand %p1237_p0, %p1231_p11 }
  0x21   :  { %1241 = shalt.err (!%p1238_p1)
}
  0x22   :  { %22 = dma.hbm_to_vmem [thread:$0]  %s1512_s0, 128, %s1330_s15, [#allocation3], %s1294_s24, %s1294_s24, %s1295_s25  }
  0x23   :  { %s1296_s10 = smov [#allocation7]   ;;  %s1242_s14 = scalar_lea.hbm %s1514_s2, 256 }
  0x24   :  { %s40_s11 = sshll.u32 %s1296_s10, 4  ;;  %p1243_p2 = scmp.ne.s32.totalorder %s1514_s2, %s1242_s14  ;;  %s41_s11 = int_to_ptr.vmem [resolvable:$true] %s40_s11 }
  0x25   :  { %p1246_p3 = scmp.lt.u32.totalorder %s1242_s14, %s1514_s2 }
  0x27   :  { %p1248_p4 = pnand %p1246_p3, %p1243_p2 }
  0x29   :  { %1251 = shalt.err (!%p1248_p4)
}
  0x2a   :  { %s1252_s20 = scalar_lea.vmem %s41_s11, 256  ;;  %p1257_p6 = scmp.lt.s32.totalorder %s41_s11, %s41_s11 }
  0x2b   :  { %p1253_p5 = scmp.ne.s32.totalorder %s41_s11, %s1252_s20  ;;  %p1258_p7 = scmp.lt.s32.totalorder %s1252_s20, %s1252_s20 }
  0x2d   :  { %p1259_p8 = por %p1258_p7, %p1257_p6 }
  0x2f   :  { %p1260_p9 = pnand %p1259_p8, %p1253_p5 }
  0x31   :  { %1263 = shalt.err (!%p1260_p9)
}
  0x32   :  { %s1297_s0 = smov 128   ;;  %s1298_s15 = smov 8  }
  0x33   :  { %46 = dma.hbm_to_vmem [thread:$0]  %s1514_s2, 256, %s41_s11, [#allocation6], %s1297_s0, %s1297_s0, %s1298_s15  }
  0x34   :  { %1286 = dma.done.wait [#allocation3], 128  }
  0x35   :  { %1287 = vsyncadd [#allocation3], 4294967168 }
  0x36   :  { %1288 = dma.done.wait [#allocation6], 1920  }
  0x37   :  { %1289 = vsyncadd [#allocation6], 4294965376  ;;  %v1299_v0 = vmov 0.0   ;;  %vm1300_vm0 = vmmov 0   ;;  %v1144_v1 = vld [vmem:[#allocation5] sm:$0xff]   ;;  %v1145_v2 = vld [vmem:[#allocation2] sm:$0xff]   ;;  %v325_v36 = vlaneseq }
  0x38   :  { %1024 = vmatprep.subr.bf16.mxu0 %v1299_v0  ;;  %1026 = vmatprep.mubr.msk.bf16.mxu0 %vm1300_vm0, %v1299_v0  ;;  %vm77_vm1 = vcmask 130048   ;;  %v1146_v3 = vld [vmem:[#allocation5 + $0x8] sm:$0xff]   ;;  %v1147_v4 = vld [vmem:[#allocation5 + $0x10] sm:$0xff]   ;;  %vm150_vm4 = vcmask 261120   ;;  %vm211_vm5 = vcmask 64512   ;;  %s1301_s2 = smov 104  }
  0x39   :  { %1030 = vmatprep.subr.bf16.mxu1 %v1299_v0  ;;  %1034 = vmatprep.mubr.msk.bf16.mxu1 %vm1300_vm0, %v1299_v0  ;;  %v947_v5 = vld [vmem:[#allocation7] ss:$0 sm:$0xff]  ;;  %v951_v17 = vld [vmem:[#allocation7 + $0x1] ss:$0 sm:$0xff]  ;;  %s1302_s23 = smov 120   ;;  %s1303_s25 = smov 96  }
  0x3a   :  { %1025 = vmatpush3.bf16.msra.mxu0 %v1144_v1  ;;  %1031 = vmatpush3.bf16.msra.mxu1 %v1146_v3  ;;  %s1304_s26 = smov 112   ;;  %v1305_v37 = vmov 1.0   ;;  %v326_v39 = vshrl.u32 %v325_v36, 7  ;;  %vm303_vm6 = vcmask 392192   ;;  %vm341_vm8 = vcmask 523264   ;;  %s1307_s27 = smov 16  }
  0x3b   :  { %1032 = vmatprep.subr.bf16.mxu1 %v1299_v0  ;;  %v301_v38 = vsel %vm77_vm1, 0.0, %v1305_v37  ;;  %vm551_vm12 = vcmask 195584   ;;  %s1309_s28 = smov [#allocation8]  }
  0x3c   :  { %v302_v40 = vsel %vm150_vm4, %v301_v38, 2.0  ;;  %v327_v41 = vsub.s32 0, %v326_v39  ;;  %s934_s29 = sshll.u32 %s1309_s28, 4  ;;  %s935_s29 = int_to_ptr.vmem [resolvable:$true] %s934_s29 }
  0x3d   :  { %1027 = vmatmul.mubr.msk.bf16.vlgmr.msra.gmra.mrb[0].mxu0 %vm77_vm1, %v1145_v2  ;;  %v304_v42 = vsel %vm303_vm6, %v302_v40, 3.0  ;;  %s1264_s30 = scalar_lea.vmem %s935_s29, 256  ;;  %p1269_p11 = scmp.lt.s32.totalorder %s935_s29, %s935_s29 }
  0x3e   :  { %1033 = vmatpush3.bf16.msra.mxu1 %v1147_v4  ;;  %v328_v43 = vrot.slane %v304_v42, %v327_v41  ;;  %p1265_p10 = scmp.ne.s32.totalorder %s935_s29, %s1264_s30  ;;  %p1270_p12 = scmp.lt.s32.totalorder %s1264_s30, %s1264_s30 }
  0x40   :  { %vm959_vm7 = vcmp.eq.f32.partialorder %v328_v43, 0.0  ;;  %vm960_vm9 = vcmp.eq.f32.partialorder %v328_v43, 1.0  ;;  %vm961_vm10 = vcmp.eq.f32.partialorder %v328_v43, 2.0  ;;  %vm962_vm11 = vcmp.eq.f32.partialorder %v328_v43, 3.0  ;;  %p1271_p13 = por %p1270_p12, %p1269_p11 }
  0x42   :  { %p1272_p0 = pnand %p1271_p13, %p1265_p10 }
 0x110   :  { %v115_v6 = vpop.f32.mrb[0].mxu0 }
 0x111   :  { %v116_v7 = vadd.f32 %v947_v5, %v115_v6  ;;  %v1028_v8 = vpop.f32.mrb[1].mxu0 }
 0x112   :  { %v118_v9 = vpop.f32.mrb[2].mxu0 }
 0x113   :  { %v124_v10 = vmul.f32 0.01, %v116_v7  ;;  %v119_v11 = vadd.f32 %v947_v5, %v118_v9  ;;  %v1029_v12 = vpop.f32.mrb[3].mxu0  ;;  %vm122_vm2 = vcmp.gt.f32.partialorder %v116_v7, 0.0 }
 0x115   :  { %vm123_vm3 = vcmp.gt.f32.partialorder %v119_v11, 0.0  ;;  %v125_v13 = vmul.f32 0.01, %v119_v11  ;;  %v1388_v14 = vsel %vm122_vm2, %v116_v7, %v124_v10 }
 0x117   :  { %v1390_v15 = vsel %vm123_vm3, %v119_v11, %v125_v13 }
 0x118   :  { %v128_v16 = vpack.c.bf16 %v1390_v15, %v1388_v14 }
 0x11a   :  { %1035 = vmatmul.mubr.msk.bf16.vlgmr.msra.gmra.mrb[0].mxu1 %vm150_vm4, %v128_v16 }
 0x1ed   :  { %v188_v18 = vpop.f32.mrb[0].mxu1 }
 0x1ee   :  { %v1036_v19 = vpop.f32.mrb[1].mxu1  ;;  %v189_v21 = vadd.f32 %v951_v17, %v188_v18 }
 0x1ef   :  { %v191_v20 = vpop.f32.mrb[2].mxu1 }
 0x1f0   :  { %v192_v22 = vadd.f32 %v951_v17, %v191_v20  ;;  %v1037_v23 = vpop.f32.mrb[3].mxu1 }
 0x1f2   :  { %v1395_v24 = vpack.c.bf16 %v192_v22, %v189_v21 }
 0x1f4   :  { %201 = vrot.lane.b32.xlu1 %v1395_v24, %s1301_s2  ;;  %197 = vrot.lane.b32.xlu0 %v1395_v24, %s1302_s23 }
 0x1f5   :  { %1046 = vmatprep.mubr.msk.bf16.mxu0 %vm211_vm5, %v1395_v24 }
 0x1f8   :  { %203 = vrot.lane.b32.xlu1 %v1395_v24, %s1303_s25  ;;  %199 = vrot.lane.b32.xlu0 %v1395_v24, %s1304_s26 }
 0x266   :  { %v1403_v25 = vpop.permute.xlu1 %201  ;;  %v1405_v26 = vpop.permute.xlu0 %197 }
 0x267   :  { %205 = vrot.lane.b32.xlu0 %v1405_v26, %s1303_s25 }
 0x26a   :  { %v204_v27 = vpop.permute.xlu1 %203  ;;  %v1408_v28 = vpop.permute.xlu0 %199 }
 0x26b   :  { %v225_v29 = vsel %vm211_vm5, %v204_v27, 0  ;;  %1106 = vmatprep.subr.msk.bf16.mxu0 %vm211_vm5, %v204_v27  ;;  %209 = vrot.lane.b32.xlu0 %v1403_v25, %s1303_s25 }
 0x26c   :  { %207 = vrot.lane.b32.xlu1 %v1408_v28, %s1303_s25  ;;  %1039 = vmatpush3.bf16.xpose.msra.mxu0 %v225_v29 }
 0x2d9   :  { %v206_v30 = vpop.permute.xlu0 %205 }
 0x2da   :  { %v228_v31 = vsel %vm211_vm5, %v206_v30, 0  ;;  %1107 = vmatprep.subr.msk.bf16.mxu0 %vm211_vm5, %v206_v30 }
 0x2db   :  { %1041 = vmatpush3.bf16.xpose.msra.mxu0 %v228_v31 }
 0x2dd   :  { %v210_v34 = vpop.permute.xlu0 %209 }
 0x2de   :  { %v208_v32 = vpop.permute.xlu1 %207  ;;  %v234_v35 = vsel %vm211_vm5, %v210_v34, 0 }
 0x2df   :  { %1108 = vmatprep.subr.msk.bf16.mxu0 %vm211_vm5, %v208_v32  ;;  %v231_v33 = vsel %vm211_vm5, %v208_v32, 0 }
 0x2e3   :  { %1043 = vmatpush3.bf16.xpose.msra.mxu0 %v231_v33 }
 0x2e4   :  { %1109 = vmatprep.subr.msk.bf16.mxu0 %vm211_vm5, %v210_v34 }
 0x2eb   :  { %1045 = vmatpush3.bf16.xpose.msra.mxu0 %v234_v35 }
 0x2ec   :  { %1086 = vmatprep.subr.bf16.mxu0 %v1299_v0 }
 0x2f2   :  { %1047 = vmatmul.mubr.msk.bf16.vlgmr.msra.gmra.mrb[4].mxu0 %vm211_vm5, %v1405_v26 }
 0x2f3   :  { %1050 = vmatprep.mubr.msk.bf16.mxu0 %vm211_vm5, %v1408_v28 }
 0x2fa   :  { %1051 = vmatmul.mubr.msk.bf16.gmra.mrb[8].mxu0 %vm211_vm5, %v1403_v25 }
 0x2fb   :  { %1094 = vmatprep.mubr.msk.bf16.mxu0 %vm1300_vm0, %v1299_v0 }
 0x3c5   :  { %v1048_v44 = vpop.f32.mrb[4].mxu0 }
 0x3c6   :  { %v270_v45 = vpop.f32.mrb[5].mxu0  ;;  %v335_v53 = vsel %vm960_vm9, %v1048_v44, -1e+30 }
 0x3c7   :  { %v333_v46 = vsel %vm959_vm7, %v270_v45, -1e+30  ;;  %v1049_v47 = vpop.f32.mrb[6].mxu0  ;;  %v348_v57 = vsel %vm341_vm8, %v335_v53, -inf }
 0x3c8   :  { %v273_v48 = vpop.f32.mrb[7].mxu0  ;;  %v342_v49 = vsel %vm341_vm8, %v333_v46, -inf  ;;  %v336_v50 = vsel %vm960_vm9, %v1049_v47, -1e+30 }
 0x3c9   :  { %v334_v51 = vsel %vm959_vm7, %v273_v48, -1e+30  ;;  %343 = vmax.xlane.f32.xlu1 %v342_v49  ;;  %v351_v54 = vsel %vm341_vm8, %v336_v50, -inf }
 0x3ca   :  { %v345_v52 = vsel %vm341_vm8, %v334_v51, -inf }
 0x3cb   :  { %346 = vmax.xlane.f32.xlu0 %v345_v52 }
 0x3cd   :  { %352 = vmax.xlane.f32.xlu1 %v351_v54  ;;  %v1052_v55 = vpop.f32.mrb[8].mxu0 }
 0x3ce   :  { %v286_v56 = vpop.f32.mrb[9].mxu0  ;;  %v339_v1 = vsel %vm962_vm11, %v1052_v55, -1e+30 }
 0x3cf   :  { %v337_v58 = vsel %vm961_vm10, %v286_v56, -1e+30  ;;  %349 = vmax.xlane.f32.xlu0 %v348_v57  ;;  %v1053_v59 = vpop.f32.mrb[10].mxu0  ;;  %v360_v3 = vsel %vm341_vm8, %v339_v1, -inf }
 0x3d0   :  { %v289_v60 = vpop.f32.mrb[11].mxu0  ;;  %v354_v62 = vsel %vm341_vm8, %v337_v58, -inf  ;;  %v340_v2 = vsel %vm962_vm11, %v1053_v59, -1e+30 }
 0x3d1   :  { %v338_v61 = vsel %vm961_vm10, %v289_v60, -1e+30  ;;  %v363_v4 = vsel %vm341_vm8, %v340_v2, -inf }
 0x3d2   :  { %v357_v63 = vsel %vm341_vm8, %v338_v61, -inf }
 0x3d3   :  { %355 = vmax.xlane.f32.xlu0 %v354_v62  ;;  %358 = vmax.xlane.f32.xlu1 %v357_v63 }
 0x3d7   :  { %361 = vmax.xlane.f32.xlu0 %v360_v3  ;;  %364 = vmax.xlane.f32.xlu1 %v363_v4 }
 0x3e8   :  { %436 = vrot.lane.b32.xlu1 %v1405_v26, %s1294_s24 }
 0x3ed   :  { %434 = vrot.lane.b32.xlu0 %v1395_v24, %s1294_s24 }
 0x456   :  { %v344_v5 = vpop.xlane.xlu1 %343 }
 0x457   :  { %v366_v9 = vsub.f32 %v333_v46, %v344_v5 }
 0x458   :  { %v347_v6 = vpop.xlane.xlu0 %346 }
 0x459   :  { %v367_v7 = vsub.f32 %v334_v51, %v347_v6  ;;  %v374_v17 = vmul.f32 1.442695, %v366_v9 }
 0x45a   :  { %v353_v8 = vpop.xlane.xlu1 %352 }
 0x45b   :  { %v369_v10 = vsub.f32 %v336_v50, %v353_v8  ;;  %v376_v11 = vmul.f32 1.442695, %v367_v7 }
 0x45c   :  { %v350_v12 = vpop.xlane.xlu0 %349 }
 0x45d   :  { %v380_v13 = vmul.f32 1.442695, %v369_v10  ;;  %v368_v16 = vsub.f32 %v335_v53, %v350_v12 }
 0x45f   :  { %1158 = vpow2.f32 %v380_v13  ;;  %v378_v18 = vmul.f32 1.442695, %v368_v16 }
 0x460   :  { %1160 = vpow2.f32 %v376_v11  ;;  %v356_v19 = vpop.xlane.xlu0 %355  ;;  %v359_v20 = vpop.xlane.xlu1 %358 }
 0x461   :  { %1162 = vpow2.f32 %v378_v18  ;;  %v370_v21 = vsub.f32 %v337_v58, %v356_v19  ;;  %v371_v22 = vsub.f32 %v338_v61, %v359_v20  ;;  %v1148_v18 = vld [vmem:[#allocation5 + $0x18] sm:$0xff]   ;;  %v1149_v19 = vld [vmem:[#allocation5 + $0x20] sm:$0xff]  }
 0x462   :  { %1164 = vpow2.f32 %v374_v17 }
 0x463   :  { %v382_v29 = vmul.f32 1.442695, %v370_v21  ;;  %v384_v32 = vmul.f32 1.442695, %v371_v22 }
 0x464   :  { %v362_v23 = vpop.xlane.xlu0 %361  ;;  %v365_v24 = vpop.xlane.xlu1 %364 }
 0x465   :  { %v372_v26 = vsub.f32 %v339_v1, %v362_v23  ;;  %v373_v27 = vsub.f32 %v340_v2, %v365_v24 }
 0x467   :  { %v386_v30 = vmul.f32 1.442695, %v372_v26  ;;  %v388_v31 = vmul.f32 1.442695, %v373_v27 }
 0x468   :  { %v435_v33 = vpop.permute.xlu0 %434  ;;  %v437_v36 = vpop.permute.xlu1 %436 }
 0x469   :  { %v1443_v34 = vpop.eup %1158  ;;  %1166 = vpow2.f32 %v386_v30  ;;  %1054 = vmatprep.subr.bf16.mxu1 %v435_v33 }
 0x46a   :  { %v1161_v35 = vpop.eup %1160  ;;  %1168 = vpow2.f32 %v388_v31  ;;  %1055 = vmatpush3.bf16.msra.mxu1 %v435_v33  ;;  %v399_v37 = vsel %vm341_vm8, %v1443_v34, 0.0 }
 0x46b   :  { %v1163_v38 = vpop.eup %1162  ;;  %1170 = vpow2.f32 %v382_v29  ;;  %400 = vadd.xlane.f32.xlu1 %v399_v37  ;;  %1056 = vmatprep.subr.bf16.mxu1 %v437_v36  ;;  %v393_v41 = vsel %vm341_vm8, %v1161_v35, 0.0 }
 0x46c   :  { %1172 = vpow2.f32 %v384_v32  ;;  %v396_v39 = vsel %vm341_vm8, %v1163_v38, 0.0  ;;  %v1165_v40 = vpop.eup %1164 }
 0x46d   :  { %397 = vadd.xlane.f32.xlu0 %v396_v39  ;;  %v390_v42 = vsel %vm341_vm8, %v1165_v40, 0.0 }
 0x46e   :  { %1057 = vmatpush3.bf16.msra.mxu1 %v437_v36 }
 0x46f   :  { %394 = vadd.xlane.f32.xlu1 %v393_v41 }
 0x471   :  { %391 = vadd.xlane.f32.xlu0 %v390_v42 }
 0x473   :  { %v1167_v43 = vpop.eup %1166 }
 0x474   :  { %v1169_v44 = vpop.eup %1168  ;;  %v408_v45 = vsel %vm341_vm8, %v1167_v43, 0.0 }
 0x475   :  { %v1171_v46 = vpop.eup %1170  ;;  %409 = vadd.xlane.f32.xlu0 %v408_v45  ;;  %v411_v47 = vsel %vm341_vm8, %v1169_v44, 0.0 }
 0x476   :  { %v1173_v48 = vpop.eup %1172  ;;  %412 = vadd.xlane.f32.xlu1 %v411_v47  ;;  %v402_v49 = vsel %vm341_vm8, %v1171_v46, 0.0 }
 0x477   :  { %v405_v50 = vsel %vm341_vm8, %v1173_v48, 0.0 }
 0x479   :  { %403 = vadd.xlane.f32.xlu0 %v402_v49  ;;  %v967_v49 = vld [vmem:[#allocation7 + $0x2] ss:$0 sm:$0xff] }
 0x47a   :  { %406 = vadd.xlane.f32.xlu1 %v405_v50 }
 0x48b   :  { %438 = vrot.lane.b32.xlu1 %v1408_v28, %s1294_s24 }
 0x48f   :  { %440 = vrot.lane.b32.xlu0 %v1403_v25, %s1294_s24  ;;  %s1306_s24 = smov 24  }
 0x4f8   :  { %v401_v51 = vpop.xlane.xlu1 %400 }
 0x4fa   :  { %v398_v52 = vpop.xlane.xlu0 %397 }
 0x4fc   :  { %v395_v53 = vpop.xlane.xlu1 %394 }
 0x4fd   :  { %1174 = vrcp.f32 %v395_v53 }
 0x4fe   :  { %v392_v54 = vpop.xlane.xlu0 %391 }
 0x4ff   :  { %1176 = vrcp.f32 %v392_v54 }
 0x500   :  { %1178 = vrcp.f32 %v398_v52 }
 0x501   :  { %1180 = vrcp.f32 %v401_v51 }
 0x502   :  { %v410_v55 = vpop.xlane.xlu0 %409 }
 0x503   :  { %v413_v56 = vpop.xlane.xlu1 %412  ;;  %1182 = vrcp.f32 %v410_v55 }
 0x506   :  { %v404_v57 = vpop.xlane.xlu0 %403 }
 0x507   :  { %v1175_v58 = vpop.eup %1174  ;;  %1184 = vrcp.f32 %v404_v57  ;;  %v407_v59 = vpop.xlane.xlu1 %406 }
 0x508   :  { %1186 = vrcp.f32 %v407_v59  ;;  %v423_v25 = vmul.f32 %v1175_v58, %v1161_v35 }
 0x509   :  { %v1177_v28 = vpop.eup %1176  ;;  %1188 = vrcp.f32 %v413_v56 }
 0x50a   :  { %v422_v60 = vmul.f32 %v1177_v28, %v1165_v40  ;;  %v1179_v61 = vpop.eup %1178  ;;  %v441_v2 = vpop.permute.xlu0 %440 }
 0x50b   :  { %v439_v62 = vpop.permute.xlu1 %438  ;;  %v1181_v1 = vpop.eup %1180  ;;  %v424_v3 = vmul.f32 %v1179_v61, %v1163_v38 }
 0x50c   :  { %1058 = vmatprep.subr.bf16.mxu1 %v439_v62  ;;  %v430_v63 = vpack.c.bf16 %v423_v25, %v422_v60  ;;  %v425_v5 = vmul.f32 %v1181_v1, %v1443_v34 }
 0x50d   :  { %1059 = vmatpush3.bf16.msra.mxu1 %v439_v62  ;;  %v1183_v4 = vpop.eup %1182 }
 0x50e   :  { %1060 = vmatprep.subr.bf16.mxu1 %v441_v2  ;;  %1062 = vmatprep.mubr.msk.bf16.mxu1 %vm341_vm8, %v430_v63  ;;  %v431_v8 = vpack.c.bf16 %v425_v5, %v424_v3  ;;  %v428_v13 = vmul.f32 %v1183_v4, %v1167_v43  ;;  %v1150_v4 = vld [vmem:[#allocation5 + $0x28] sm:$0xff]   ;;  %v1152_v5 = vld [vmem:[#allocation5 + $0x38] sm:$0xff]  }
 0x50f   :  { %1087 = vmatpush3.bf16.msra.mxu0 %v1152_v5 }
 0x510   :  { %1088 = vmatprep.subr.bf16.mxu0 %v1299_v0 }
 0x511   :  { %v1185_v6 = vpop.eup %1184  ;;  %1061 = vmatpush3.bf16.msra.mxu1 %v441_v2 }
 0x512   :  { %v1187_v7 = vpop.eup %1186  ;;  %v426_v9 = vmul.f32 %v1185_v6, %v1171_v46  ;;  %1070 = vmatprep.subr.bf16.mxu1 %v1299_v0  ;;  %v1153_v6 = vld [vmem:[#allocation5 + $0x40] sm:$0xff]  }
 0x513   :  { %v1189_v10 = vpop.eup %1188  ;;  %v427_v11 = vmul.f32 %v1187_v7, %v1173_v48  ;;  %1089 = vmatpush3.bf16.msra.mxu0 %v1153_v6 }
 0x514   :  { %1063 = vmatmul.mubr.msk.bf16.vlgmr.msra.gmra.mrb[4].mxu1 %vm341_vm8, %v431_v8  ;;  %v429_v16 = vmul.f32 %v1189_v10, %v1169_v44  ;;  %1090 = vmatprep.subr.bf16.mxu0 %v1299_v0 }
 0x515   :  { %v432_v12 = vpack.c.bf16 %v427_v11, %v426_v9  ;;  %1071 = vmatpush3.bf16.msra.mxu1 %v1148_v18 }
 0x516   :  { %v433_v17 = vpack.c.bf16 %v429_v16, %v428_v13  ;;  %1072 = vmatprep.subr.bf16.mxu1 %v1299_v0 }
 0x517   :  { %1066 = vmatprep.mubr.msk.bf16.mxu1 %vm341_vm8, %v432_v12 }
 0x519   :  { %1073 = vmatpush3.bf16.msra.mxu1 %v1149_v19 }
 0x51a   :  { %1078 = vmatprep.subr.bf16.mxu1 %v1299_v0 }
 0x51c   :  { %1067 = vmatmul.mubr.msk.bf16.gmra.mrb[8].mxu1 %vm341_vm8, %v433_v17  ;;  %v971_v17 = vld [vmem:[#allocation7 + $0x5] ss:$0 sm:$0xff] }
 0x51d   :  { %1074 = vmatprep.mubr.msk.bf16.mxu1 %vm1300_vm0, %v1299_v0 }
 0x5e7   :  { %v1064_v20 = vpop.f32.mrb[4].mxu1 }
 0x5e8   :  { %v492_v21 = vpop.f32.mrb[5].mxu1 }
 0x5e9   :  { %v1065_v22 = vpop.f32.mrb[6].mxu1 }
 0x5ea   :  { %v1128_v23 = vpack.i.bf16 %v1065_v22, %v1064_v20  ;;  %v495_v24 = vpop.f32.mrb[7].mxu1 }
 0x5ec   :  { %1129 = vrot.lane.b32.xlu1 %v1128_v23, %s1298_s15 }
 0x5ef   :  { %v1068_v26 = vpop.f32.mrb[8].mxu1 }
 0x5f0   :  { %v508_v27 = vpop.f32.mrb[9].mxu1 }
 0x5f1   :  { %v1069_v29 = vpop.f32.mrb[10].mxu1 }
 0x5f2   :  { %v1138_v30 = vpack.i.bf16 %v1069_v29, %v1068_v26  ;;  %v511_v31 = vpop.f32.mrb[11].mxu1  ;;  %v1155_v29 = vld [vmem:[#allocation5 + $0x50] sm:$0xff]  }
 0x5f3   :  { %v1133_v32 = vpack.i.bf16 %v511_v31, %v508_v27  ;;  %v1154_v27 = vld [vmem:[#allocation5 + $0x48] sm:$0xff]  }
 0x5f4   :  { %1139 = vrot.lane.b32.xlu1 %v1138_v30, %s1306_s24  ;;  %1091 = vmatpush3.bf16.msra.mxu0 %v1154_v27  ;;  %v973_v30 = vld [vmem:[#allocation7 + $0x3] ss:$0 sm:$0xff] }
 0x5f5   :  { %1134 = vrot.lane.b32.xlu0 %v1133_v32, %s1307_s27  ;;  %1092 = vmatprep.subr.bf16.mxu0 %v1299_v0 }
 0x5f8   :  { %1093 = vmatpush3.bf16.msra.mxu0 %v1155_v29 }
 0x65e   :  { %v1130_v33 = vpop.permute.xlu1 %1129 }
 0x65f   :  { %v1132_v34 = vunpack.i.h.bf16 %v1130_v33  ;;  %v1131_v35 = vunpack.i.l.bf16 %v1130_v33 }
 0x661   :  { %v547_v40 = vsel %vm211_vm5, %v492_v21, %v1131_v35  ;;  %v548_v41 = vsel %vm211_vm5, %v495_v24, %v1132_v34  ;;  %v972_v21 = vld [vmem:[#allocation7 + $0x6] ss:$0 sm:$0xff] }
 0x666   :  { %v1140_v36 = vpop.permute.xlu1 %1139 }
 0x667   :  { %v1135_v37 = vpop.permute.xlu0 %1134  ;;  %v1142_v42 = vunpack.i.h.bf16 %v1140_v36  ;;  %v1141_v43 = vunpack.i.l.bf16 %v1140_v36 }
 0x668   :  { %v1137_v38 = vunpack.i.h.bf16 %v1135_v37  ;;  %v1136_v39 = vunpack.i.l.bf16 %v1135_v37 }
 0x66a   :  { %v550_v44 = vsel %vm77_vm1, %v548_v41, %v1137_v38  ;;  %v549_v45 = vsel %vm77_vm1, %v547_v40, %v1136_v39  ;;  %v977_v40 = vld [vmem:[#allocation7 + $0x4] ss:$0 sm:$0xff] }
 0x66b   :  { %v553_v46 = vsel %vm551_vm12, %v550_v44, %v1142_v42  ;;  %v552_v47 = vsel %vm551_vm12, %v549_v45, %v1141_v43 }
 0x66c   :  { %v554_v48 = vpack.c.bf16 %v553_v46, %v552_v47 }
 0x66e   :  { %1075 = vmatmul.mubr.msk.bf16.vlgmr.msra.gmra.mrb[12].mxu1 %vm150_vm4, %v554_v48 }
 0x66f   :  { %1082 = vmatprep.mubr.msk.bf16.mxu1 %vm1300_vm0, %v1299_v0  ;;  %1079 = vmatpush3.bf16.msra.mxu1 %v1150_v4  ;;  %v983_v4 = vld [vmem:[#allocation7 + $0x7] ss:$0 sm:$0xff] }
 0x670   :  { %1080 = vmatprep.subr.bf16.mxu1 %v1299_v0 }
 0x741   :  { %v613_v50 = vpop.f32.mrb[12].mxu1 }
 0x742   :  { %v614_v51 = vadd.f32 %v967_v49, %v613_v50  ;;  %v1076_v52 = vpop.f32.mrb[13].mxu1 }
 0x743   :  { %v616_v53 = vpop.f32.mrb[14].mxu1 }
 0x744   :  { %v617_v54 = vadd.f32 %v967_v49, %v616_v53  ;;  %v1077_v55 = vpop.f32.mrb[15].mxu1  ;;  %v620_v56 = vadd.f32 %v614_v51, %v1388_v14 }
 0x746   :  { %v624_v57 = vsel %vm150_vm4, %v620_v56, 0.0  ;;  %v621_v58 = vadd.f32 %v617_v54, %v1390_v15  ;;  %v1151_v15 = vld [vmem:[#allocation5 + $0x30] sm:$0xff]  }
 0x747   :  { %625 = vadd.xlane.f32.xlu0 %v624_v57  ;;  %1081 = vmatpush3.bf16.msra.mxu1 %v1151_v15 }
 0x748   :  { %v627_v59 = vsel %vm150_vm4, %v621_v58, 0.0  ;;  %1098 = vmatprep.subr.bf16.mxu1 %v1299_v0 }
 0x749   :  { %628 = vadd.xlane.f32.xlu1 %v627_v59 }
 0x7d4   :  { %v626_v28 = vpop.xlane.xlu0 %625 }
 0x7d5   :  { %v631_v60 = vmul.f32 0.03125, %v626_v28 }
 0x7d6   :  { %v629_v25 = vpop.xlane.xlu1 %628 }
 0x7d7   :  { %v633_v61 = vsub.f32 %v620_v56, %v631_v60  ;;  %v632_v62 = vmul.f32 0.03125, %v629_v25  ;;  %v1156_v60 = vld [vmem:[#allocation5 + $0x58] sm:$0xff]   ;;  %v1157_v25 = vld [vmem:[#allocation5 + $0x60] sm:$0xff]  }
 0x7d9   :  { %v634_v63 = vsub.f32 %v621_v58, %v632_v62  ;;  %v635_v1 = vmul.f32 %v633_v61, %v633_v61 }
 0x7db   :  { %v637_v2 = vsel %vm150_vm4, %v635_v1, 0.0  ;;  %v636_v3 = vmul.f32 %v634_v63, %v634_v63 }
 0x7dc   :  { %638 = vadd.xlane.f32.xlu0 %v637_v2 }
 0x7dd   :  { %v640_v14 = vsel %vm150_vm4, %v636_v3, 0.0 }
 0x7e0   :  { %641 = vadd.xlane.f32.xlu0 %v640_v14 }
 0x869   :  { %v639_v7 = vpop.xlane.xlu0 %638 }
 0x86a   :  { %v643_v8 = vmul.f32 0.03125, %v639_v7 }
 0x86c   :  { %v645_v9 = vadd.f32 1e-05, %v643_v8  ;;  %v984_v8 = vld [vmem:[#allocation7 + $0x8] ss:$0 sm:$0xff] }
 0x86d   :  { %v642_v10 = vpop.xlane.xlu0 %641 }
 0x86e   :  { %1190 = vrsqrt.f32 %v645_v9  ;;  %v644_v11 = vmul.f32 0.03125, %v642_v10 }
 0x870   :  { %v646_v12 = vadd.f32 1e-05, %v644_v11 }
 0x872   :  { %1192 = vrsqrt.f32 %v646_v12  ;;  %v1308_v12 = vmov 0  }
 0x873   :  { %1143 = vset.pattern.permute.xlu0 %v1308_v12 }
 0x878   :  { %v1191_v13 = vpop.eup %1190 }
 0x879   :  { %v649_v16 = vmul.f32 %v1191_v13, %v633_v61  ;;  %v985_v13 = vld [vmem:[#allocation7 + $0x9] ss:$0 sm:$0xff] }
 0x87b   :  { %v655_v19 = vmul.f32 %v971_v17, %v649_v16 }
 0x87c   :  { %v1193_v18 = vpop.eup %1192 }
 0x87d   :  { %v650_v20 = vmul.f32 %v1193_v18, %v634_v63  ;;  %v661_v23 = vadd.f32 %v972_v21, %v655_v19 }
 0x87f   :  { %v656_v22 = vmul.f32 %v971_v17, %v650_v20 }
 0x881   :  { %v662_v24 = vadd.f32 %v972_v21, %v656_v22 }
 0x883   :  { %v663_v26 = vpack.c.bf16 %v662_v24, %v661_v23 }
 0x885   :  { %1083 = vmatmul.mubr.msk.bf16.vlgmr.msra.gmra.mrb[16].mxu1 %vm150_vm4, %v663_v26 }
 0x886   :  { %1102 = vmatprep.mubr.msk.bf16.mxu1 %vm1300_vm0, %v1299_v0  ;;  %1099 = vmatpush3.bf16.msra.mxu1 %v1156_v60 }
 0x887   :  { %1100 = vmatprep.subr.bf16.mxu1 %v1299_v0 }
 0x88a   :  { %1101 = vmatpush3.bf16.msra.mxu1 %v1157_v25 }
 0x958   :  { %v722_v31 = vpop.f32.mrb[16].mxu1 }
 0x959   :  { %v723_v32 = vadd.f32 %v973_v30, %v722_v31  ;;  %v1084_v33 = vpop.f32.mrb[17].mxu1 }
 0x95a   :  { %v725_v34 = vpop.f32.mrb[18].mxu1 }
 0x95b   :  { %v726_v35 = vadd.f32 %v973_v30, %v725_v34  ;;  %v1085_v36 = vpop.f32.mrb[19].mxu1  ;;  %v729_v37 = vmax.f32 %v723_v32, 0.0 }
 0x95d   :  { %v730_v38 = vmax.f32 %v726_v35, 0.0 }
 0x95f   :  { %v731_v39 = vpack.c.bf16 %v730_v38, %v729_v37 }
 0x961   :  { %1095 = vmatmul.mubr.msk.bf16.vlgmr.msra.gmra.mrb[12].mxu0 %vm341_vm8, %v731_v39 }
 0xa34   :  { %v806_v41 = vpop.f32.mrb[12].mxu0 }
 0xa35   :  { %v807_v42 = vadd.f32 %v977_v40, %v806_v41  ;;  %v1096_v43 = vpop.f32.mrb[13].mxu0 }
 0xa36   :  { %v809_v44 = vpop.f32.mrb[14].mxu0 }
 0xa37   :  { %v810_v45 = vadd.f32 %v977_v40, %v809_v44  ;;  %v1097_v46 = vpop.f32.mrb[15].mxu0  ;;  %v813_v47 = vadd.f32 %v807_v42, %v661_v23 }
 0xa39   :  { %v817_v48 = vsel %vm150_vm4, %v813_v47, 0.0  ;;  %v814_v49 = vadd.f32 %v810_v45, %v662_v24 }
 0xa3a   :  { %818 = vadd.xlane.f32.xlu1 %v817_v48 }
 0xa3b   :  { %v820_v50 = vsel %vm150_vm4, %v814_v49, 0.0 }
 0xa3c   :  { %821 = vadd.xlane.f32.xlu0 %v820_v50 }
 0xac7   :  { %v819_v51 = vpop.xlane.xlu1 %818 }
 0xac8   :  { %v823_v52 = vmul.f32 0.03125, %v819_v51 }
 0xac9   :  { %v822_v53 = vpop.xlane.xlu0 %821 }
 0xaca   :  { %v825_v54 = vsub.f32 %v813_v47, %v823_v52  ;;  %v824_v55 = vmul.f32 0.03125, %v822_v53 }
 0xacc   :  { %v826_v56 = vsub.f32 %v814_v49, %v824_v55  ;;  %v827_v57 = vmul.f32 %v825_v54, %v825_v54 }
 0xace   :  { %v829_v58 = vsel %vm150_vm4, %v827_v57, 0.0  ;;  %v828_v59 = vmul.f32 %v826_v56, %v826_v56 }
 0xacf   :  { %830 = vadd.xlane.f32.xlu1 %v829_v58 }
 0xad0   :  { %v832_v28 = vsel %vm150_vm4, %v828_v59, 0.0 }
 0xad1   :  { %833 = vadd.xlane.f32.xlu0 %v832_v28 }
 0xb5c   :  { %v831_v61 = vpop.xlane.xlu1 %830 }
 0xb5d   :  { %v835_v62 = vmul.f32 0.03125, %v831_v61 }
 0xb5e   :  { %v834_v63 = vpop.xlane.xlu0 %833 }
 0xb5f   :  { %v837_v1 = vadd.f32 1e-05, %v835_v62  ;;  %v836_v2 = vmul.f32 0.03125, %v834_v63 }
 0xb61   :  { %1194 = vrsqrt.f32 %v837_v1  ;;  %v838_v3 = vadd.f32 1e-05, %v836_v2 }
 0xb63   :  { %1196 = vrsqrt.f32 %v838_v3 }
 0xb6b   :  { %v1195_v14 = vpop.eup %1194 }
 0xb6c   :  { %v841_v15 = vmul.f32 %v1195_v14, %v825_v54 }
 0xb6d   :  { %v1197_v5 = vpop.eup %1196 }
 0xb6e   :  { %v847_v6 = vmul.f32 %v983_v4, %v841_v15  ;;  %v842_v7 = vmul.f32 %v1197_v5, %v826_v56 }
 0xb70   :  { %v848_v9 = vmul.f32 %v983_v4, %v842_v7  ;;  %v853_v10 = vadd.f32 %v984_v8, %v847_v6 }
 0xb72   :  { %v854_v0 = vadd.f32 %v984_v8, %v848_v9 }
 0xb74   :  { %v855_v11 = vpack.c.bf16 %v854_v0, %v853_v10 }
 0xb76   :  { %1103 = vmatmul.mubr.msk.bf16.vlgmr.msra.gmra.mrb[20].mxu1 %vm150_vm4, %v855_v11 }
 0xc49   :  { %v914_v16 = vpop.f32.mrb[20].mxu1 }
 0xc4a   :  { %v915_v17 = vadd.f32 %v985_v13, %v914_v16  ;;  %v1104_v18 = vpop.f32.mrb[21].mxu1 }
 0xc4b   :  { %v917_v19 = vpop.f32.mrb[22].mxu1 }
 0xc4c   :  { %vm921_vm13 = vcmp.gt.f32.partialorder %v915_v17, 0.0  ;;  %v923_v20 = vmul.f32 0.01, %v915_v17  ;;  %v918_v21 = vadd.f32 %v985_v13, %v917_v19  ;;  %v1105_v22 = vpop.f32.mrb[23].mxu1 }
 0xc4e   :  { %vm922_vm14 = vcmp.gt.f32.partialorder %v918_v21, 0.0  ;;  %v924_v23 = vmul.f32 0.01, %v918_v21  ;;  %v925_v24 = vsel %vm921_vm13, %v915_v17, %v923_v20 }
 0xc4f   :  { %927 = vst [vmem:[#allocation8] sm:$0xff] %v925_v24 }
 0xc50   :  { %v926_v26 = vsel %vm922_vm14, %v918_v21, %v924_v23 }
 0xc51   :  { %928 = vst [vmem:[#allocation8 + $0x8] sm:$0xff] %v926_v26 }
 0xc52   :  { %1275 = shalt.err (!%p1272_p0)
}
 0xc53   :  { %s1276_s6 = scalar_lea.hbm %s1515_s3, 256 }
 0xc54   :  { %p1277_p1 = scmp.ne.s32.totalorder %s1515_s3, %s1276_s6  ;;  %p1280_p2 = scmp.lt.u32.totalorder %s1276_s6, %s1515_s3 }
 0xc56   :  { %p1282_p3 = pnand %p1280_p2, %p1277_p1 }
 0xc58   :  { %1285 = shalt.err (!%p1282_p3)
}
 0xc59   :  { %940 = dma.vmem_to_hbm [thread:$0]  %s935_s29, 256, %s1515_s3, [#allocation4], %s1297_s0, %s1297_s0, %s1298_s15  }
 0xc5a   :  { %1290 = dma.done.wait [#allocation4], 256  }
 0xc5b   :  { %1291 = vsyncadd [#allocation4], 4294967040 }
 0xc5c   :  { %944 = vsyncpa [#allocation3], 1 }
 0xc5d   :  { %945 = vsyncpa [#allocation6], 1 }
 0xc5e   :  { %946 = vsyncpa [#allocation4], 1 }

</bundles_post_ra>
